<compile_context>
chip_gen: v5e
topology: v5e:2x2
jax: 0.10.0
libtpu: 0.0.40
codegen_flags: <defaults>
</compile_context>

<pallas_src>
import jax
import jax.numpy as jnp
from jax.experimental import pallas as pl
from jax.experimental.pallas import tpu as pltpu


def _round_up(x, m):
    return ((x + m - 1) // m) * m


def bag_of_word_forward(inputs, embed, w1, b1, w2, b2,
                        *, tb=256, tv=512, compute_dtype=jnp.bfloat16):
    """Forward pass of BagOfWord.

    inputs: (B, S) int32 token ids.
    embed:  (V, E) frozen embedding table (f32).
    w1: (E, H), b1: (H,), w2: (H, C), b2: (C,)   (weights laid out (in, out)).
    tb: batch tile (multiple of 16; clamped to the padded batch).
    tv: vocabulary chunk streamed per reduction step (multiple of 128).
    """
    B, S = inputs.shape
    V, E = embed.shape
    H = w1.shape[1]
    C = w2.shape[1]

    # ---- tile / padding geometry -------------------------------------------------
    # Batch tile: >= 16 (bf16 sublane packing), multiple of 16, clamped to the batch.
    b_ceil = _round_up(B, 16)
    tb = _round_up(min(tb, b_ceil), 16)
    # v7x has 2 TensorCores: prefer >= 2 batch grid steps when the batch allows it,
    # so the "parallel" axis actually shards across cores (no-op on v5e/v6e).
    if b_ceil // tb < 2 and b_ceil >= 32:
        tb = _round_up(b_ceil // 2, 16)
    b_pad = _round_up(B, tb)
    grid_b = b_pad // tb

    # Vocabulary chunk: multiple of 128 (it is the lane dim of the counts tile).
    tv = _round_up(min(tv, _round_up(V, 128)), 128)
    v_pad = _round_up(V, tv)
    grid_k = v_pad // tv

    # Lane-dense feature dims.
    e_pad = _round_up(E, 128)
    h_pad = _round_up(H, 128)
    c_pad = _round_up(C, 128)

    # ---- glue: bag-of-words histogram (B, V) -------------------------------------
    # Integer counts; exact in bf16 as long as every count <= 256 (i.e. S <= 256).
    counts_f32 = jnp.zeros((B, V), jnp.float32).at[
        jnp.arange(B)[:, None], inputs].add(1.0)
    table_dtype = compute_dtype if S <= 256 else jnp.float32
    counts_p = jnp.pad(counts_f32, ((0, b_pad - B), (0, v_pad - V))).astype(table_dtype)

    # MXU operands in compute dtype; biases and accumulation stay f32.
    embed_p = jnp.pad(embed, ((0, v_pad - V), (0, e_pad - E))).astype(table_dtype)
    w1_p = jnp.pad(w1, ((0, e_pad - E), (0, h_pad - H))).astype(compute_dtype)
    b1_p = jnp.pad(b1, ((0, h_pad - H),)).reshape(1, h_pad).astype(jnp.float32)
    w2_p = jnp.pad(w2, ((0, h_pad - H), (0, c_pad - C))).astype(compute_dtype)
    b2_p = jnp.pad(b2, ((0, c_pad - C),)).reshape(1, c_pad).astype(jnp.float32)

    inv_s = 1.0 / float(S)  # applied in f32 AFTER the accumulation (exact mean)

    def kernel(counts_ref, embed_ref, w1_ref, b1_ref, w2_ref, b2_ref, o_ref, acc_ref):
        # counts_ref: (tb, tv)        embed_ref: (tv, e_pad)
        # w1_ref: (e_pad, h_pad)      b1_ref: (1, h_pad)
        # w2_ref: (h_pad, c_pad)      b2_ref: (1, c_pad)
        # o_ref:  (tb, c_pad) f32     acc_ref: (tb, e_pad) f32 scratch
        k = pl.program_id(1)

        @pl.when(k == 0)
        def _():
            acc_ref[...] = jnp.zeros_like(acc_ref)

        # Streamed bag-of-words reduction: sum_k counts_chunk @ embed_chunk
        acc_ref[...] += jnp.dot(counts_ref[...], embed_ref[...],
                                preferred_element_type=jnp.float32)

        @pl.when(k == pl.num_programs(1) - 1)
        def _():
            # mean over the sequence (f32), then fc1 + relu + fc2 on the MXU.
            m = (acc_ref[...] * inv_s).astype(compute_dtype)                 # (tb, e_pad)
            h = jnp.dot(m, w1_ref[...],
                        preferred_element_type=jnp.float32) + b1_ref[...]    # (tb, h_pad)
            r = jnp.maximum(h, 0.0)
            # dropout: identity at inference
            out = jnp.dot(r.astype(compute_dtype), w2_ref[...],
                          preferred_element_type=jnp.float32) + b2_ref[...]  # (tb, c_pad)
            o_ref[...] = out.astype(o_ref.dtype)

    # ---- VMEM budget (actual resident buffers + headroom, <= 64 MiB v7x physical) --
    t_sz = jnp.dtype(table_dtype).itemsize
    w_sz = jnp.dtype(compute_dtype).itemsize
    vmem_bytes = (
        2 * tb * tv * t_sz           # counts tiles (double buffered)
        + 2 * tv * e_pad * t_sz      # embed chunks (double buffered)
        + e_pad * h_pad * w_sz       # w1 (single buffered)
        + h_pad * 4                  # b1
        + h_pad * c_pad * w_sz       # w2 (single buffered)
        + c_pad * 4                  # b2
        + 2 * tb * c_pad * 4         # output tiles (double buffered)
        + tb * e_pad * 4             # f32 accumulator scratch
    )
    vmem_limit = int(min(max(2 * vmem_bytes + (4 << 20), 8 << 20), 64 << 20))

    flops = 2 * b_pad * (v_pad * e_pad + e_pad * h_pad + h_pad * c_pad)
    bytes_accessed = (
        b_pad * v_pad * t_sz                      # histogram
        + grid_b * v_pad * e_pad * t_sz           # table re-read per batch tile
        + e_pad * h_pad * w_sz + h_pad * c_pad * w_sz
        + (h_pad + c_pad) * 4
        + b_pad * c_pad * 4                       # output
    )

    const_w = dict(pipeline_mode=pl.Buffered(1))  # index never changes across the grid

    out = pl.pallas_call(
        kernel,
        out_shape=jax.ShapeDtypeStruct((b_pad, c_pad), jnp.float32),
        grid_spec=pltpu.PrefetchScalarGridSpec(
            num_scalar_prefetch=0,
            grid=(grid_b, grid_k),                 # reduction (vocab) axis last
            in_specs=[
                pl.BlockSpec((tb, tv), lambda i, k: (i, k)),        # histogram chunk
                pl.BlockSpec((tv, e_pad), lambda i, k: (k, 0)),     # embed chunk
                pl.BlockSpec((e_pad, h_pad), lambda i, k: (0, 0), **const_w),
                pl.BlockSpec((1, h_pad), lambda i, k: (0, 0), **const_w),
                pl.BlockSpec((h_pad, c_pad), lambda i, k: (0, 0), **const_w),
                pl.BlockSpec((1, c_pad), lambda i, k: (0, 0), **const_w),
            ],
            out_specs=pl.BlockSpec((tb, c_pad), lambda i, k: (i, 0)),
            scratch_shapes=[pltpu.VMEM((tb, e_pad), jnp.float32)],
        ),
        compiler_params=pltpu.CompilerParams(
            dimension_semantics=("parallel", "arbitrary"),
            vmem_limit_bytes=vmem_limit,
        ),
        cost_estimate=pl.CostEstimate(flops=flops, transcendentals=0,
                                      bytes_accessed=bytes_accessed),
    )(counts_p, embed_p, w1_p, b1_p, w2_p, b2_p)

    return out[:B, :C]


def reference_forward(inputs, embed, w1, b1, w2, b2):
    """Pure-JAX f32 reference matching the PyTorch module op-for-op."""
    x = embed[inputs]                      # (B, S, E)
    h = x @ w1 + b1                        # (B, S, H)
    m = jnp.mean(h, axis=1)                # (B, H)
    r = jnp.maximum(m, 0.0)
    return r @ w2 + b2                     # (B, C)


if __name__ == "__main__":
    key = jax.random.PRNGKey(0)
    B, S = 2, 8           # batch, sequence length
    V, E = 16, 32         # vocab size, embed_size
    H, C = 32, 8          # hidden_size, num_class

    k_emb, k_w1, k_b1, k_w2, k_b2, k_in = jax.random.split(key, 6)
    embed = jax.random.normal(k_emb, (V, E), dtype=jnp.float32)
    w1 = jax.random.normal(k_w1, (E, H), dtype=jnp.float32) * 0.1
    b1 = jax.random.normal(k_b1, (H,), dtype=jnp.float32) * 0.1
    w2 = jax.random.normal(k_w2, (H, C), dtype=jnp.float32) * 0.1
    b2 = jax.random.normal(k_b2, (C,), dtype=jnp.float32) * 0.1
    inputs = jax.random.randint(k_in, (B, S), 0, V, dtype=jnp.int32)

    out = bag_of_word_forward(inputs, embed, w1, b1, w2, b2)
    out = jax.block_until_ready(out)

    ref = reference_forward(inputs, embed, w1, b1, w2, b2)
    assert out.shape == (B, C)
    # bf16 MXU path + mean/fc1 reassociation => slightly looser tolerance than pure f32
    assert jnp.allclose(out, ref, atol=1e-2, rtol=1e-2), (out, ref)

    print("KERNEL_OK")
</pallas_src>

<mosaic_0001>
module attributes {stable_mosaic.version = 11 : i64} {
  func.func @kernel(%arg0: i32, %arg1: i32, %arg2: memref<16x128xbf16, #tpu.memory_space<vmem>>, %arg3: memref<128x128xbf16, #tpu.memory_space<vmem>>, %arg4: memref<128x128xbf16, #tpu.memory_space<vmem>>, %arg5: memref<1x128xf32, #tpu.memory_space<vmem>>, %arg6: memref<128x128xbf16, #tpu.memory_space<vmem>>, %arg7: memref<1x128xf32, #tpu.memory_space<vmem>>, %arg8: memref<16x128xf32, #tpu.memory_space<vmem>>, %arg9: memref<16x128xf32, #tpu.memory_space<vmem>>) attributes {dimension_semantics = [#tpu.dimension_semantics<parallel>, #tpu.dimension_semantics<arbitrary>], iteration_bounds = array<i64: 1, 1>, scalar_prefetch = 0 : i64, scratch_operands = 1 : i64, tpu.core_type = #tpu.core_type<tc>, window_params = [{transform_indices = @transform_0, window_bounds = array<i64: 16, 128>}, {transform_indices = @transform_1, window_bounds = array<i64: 128, 128>}, {pipeline_mode = #tpu.pipeline_mode<synchronous>, transform_indices = @transform_2, window_bounds = array<i64: 128, 128>}, {pipeline_mode = #tpu.pipeline_mode<synchronous>, transform_indices = @transform_3, window_bounds = array<i64: 1, 128>}, {pipeline_mode = #tpu.pipeline_mode<synchronous>, transform_indices = @transform_4, window_bounds = array<i64: 128, 128>}, {pipeline_mode = #tpu.pipeline_mode<synchronous>, transform_indices = @transform_5, window_bounds = array<i64: 1, 128>}, {transform_indices = @transform_6, window_bounds = array<i64: 16, 128>}]} {
    %c0_i32 = arith.constant 0 : i32
    %0 = arith.cmpi eq, %arg1, %c0_i32 : i32
    %1 = arith.extui %0 : i1 to i32
    %c0_i32_0 = arith.constant 0 : i32
    %2 = arith.cmpi ne, %1, %c0_i32_0 : i32
    scf.if %2 {
      %cst_10 = arith.constant 0.000000e+00 : f32
      %12 = vector.broadcast %cst_10 : f32 to vector<16x128xf32>
      %c0_11 = arith.constant 0 : index
      %c0_12 = arith.constant 0 : index
      %13 = vector.load %arg9[%c0_11, %c0_12] : memref<16x128xf32, #tpu.memory_space<vmem>>, vector<16x128xf32>
      tpu.vector_store %arg9[%c0_11, %c0_12], %12 {strides = array<i32>} : memref<16x128xf32, #tpu.memory_space<vmem>>, vector<16x128xf32>,
    } else {
    }
    %c0 = arith.constant 0 : index
    %c0_1 = arith.constant 0 : index
    %3 = vector.load %arg9[%c0, %c0_1] : memref<16x128xf32, #tpu.memory_space<vmem>>, vector<16x128xf32>
    %c0_2 = arith.constant 0 : index
    %c0_3 = arith.constant 0 : index
    %4 = vector.load %arg2[%c0_2, %c0_3] : memref<16x128xbf16, #tpu.memory_space<vmem>>, vector<16x128xbf16>
    %c0_4 = arith.constant 0 : index
    %c0_5 = arith.constant 0 : index
    %5 = vector.load %arg3[%c0_4, %c0_5] : memref<128x128xbf16, #tpu.memory_space<vmem>>, vector<128x128xbf16>
    %cst = arith.constant dense<0.000000e+00> : vector<16x128xf32>
    %6 = tpu.matmul %4, %5, %cst {dimension_numbers = #tpu.dot_dimension_numbers<[1], [0], [0], [1], [0, 0, 1, 1], [], []>} : vector<16x128xbf16>, vector<128x128xbf16>, vector<16x128xf32> -> vector<16x128xf32>
    %7 = arith.addf %3, %6 : vector<16x128xf32>
    %c0_6 = arith.constant 0 : index
    %c0_7 = arith.constant 0 : index
    %8 = vector.load %arg9[%c0_6, %c0_7] : memref<16x128xf32, #tpu.memory_space<vmem>>, vector<16x128xf32>
    tpu.vector_store %arg9[%c0_6, %c0_7], %7 {strides = array<i32>} : memref<16x128xf32, #tpu.memory_space<vmem>>, vector<16x128xf32>,
    %c0_i32_8 = arith.constant 0 : i32
    %9 = arith.cmpi eq, %arg1, %c0_i32_8 : i32
    %10 = arith.extui %9 : i1 to i32
    %c0_i32_9 = arith.constant 0 : i32
    %11 = arith.cmpi ne, %10, %c0_i32_9 : i32
    scf.if %11 {
      %c0_10 = arith.constant 0 : index
      %c0_11 = arith.constant 0 : index
      %12 = vector.load %arg9[%c0_10, %c0_11] : memref<16x128xf32, #tpu.memory_space<vmem>>, vector<16x128xf32>
      %cst_12 = arith.constant 1.250000e-01 : f32
      %13 = vector.broadcast %cst_12 : f32 to vector<16x128xf32>
      %14 = arith.mulf %12, %13 : vector<16x128xf32>
      %15 = arith.truncf %14 : vector<16x128xf32> to vector<16x128xbf16>
      %c0_13 = arith.constant 0 : index
      %c0_14 = arith.constant 0 : index
      %16 = vector.load %arg4[%c0_13, %c0_14] : memref<128x128xbf16, #tpu.memory_space<vmem>>, vector<128x128xbf16>
      %cst_15 = arith.constant dense<0.000000e+00> : vector<16x128xf32>
      %17 = tpu.matmul %15, %16, %cst_15 {dimension_numbers = #tpu.dot_dimension_numbers<[1], [0], [0], [1], [0, 0, 1, 1], [], []>} : vector<16x128xbf16>, vector<128x128xbf16>, vector<16x128xf32> -> vector<16x128xf32>
      %c0_16 = arith.constant 0 : index
      %c0_17 = arith.constant 0 : index
      %18 = vector.load %arg5[%c0_16, %c0_17] : memref<1x128xf32, #tpu.memory_space<vmem>>, vector<1x128xf32>
      %19 = vector.broadcast %18 : vector<1x128xf32> to vector<16x128xf32>
      %20 = arith.addf %17, %19 : vector<16x128xf32>
      %cst_18 = arith.constant 0.000000e+00 : f32
      %21 = vector.broadcast %cst_18 : f32 to vector<16x128xf32>
      %22 = arith.maximumf %20, %21 : vector<16x128xf32>
      %23 = arith.truncf %22 : vector<16x128xf32> to vector<16x128xbf16>
      %c0_19 = arith.constant 0 : index
      %c0_20 = arith.constant 0 : index
      %24 = vector.load %arg6[%c0_19, %c0_20] : memref<128x128xbf16, #tpu.memory_space<vmem>>, vector<128x128xbf16>
      %cst_21 = arith.constant dense<0.000000e+00> : vector<16x128xf32>
      %25 = tpu.matmul %23, %24, %cst_21 {dimension_numbers = #tpu.dot_dimension_numbers<[1], [0], [0], [1], [0, 0, 1, 1], [], []>} : vector<16x128xbf16>, vector<128x128xbf16>, vector<16x128xf32> -> vector<16x128xf32>
      %c0_22 = arith.constant 0 : index
      %c0_23 = arith.constant 0 : index
      %26 = vector.load %arg7[%c0_22, %c0_23] : memref<1x128xf32, #tpu.memory_space<vmem>>, vector<1x128xf32>
      %27 = vector.broadcast %26 : vector<1x128xf32> to vector<16x128xf32>
      %28 = arith.addf %25, %27 : vector<16x128xf32>
      %c0_24 = arith.constant 0 : index
      %c0_25 = arith.constant 0 : index
      %29 = vector.load %arg8[%c0_24, %c0_25] : memref<16x128xf32, #tpu.memory_space<vmem>>, vector<16x128xf32>
      tpu.vector_store %arg8[%c0_24, %c0_25], %28 {strides = array<i32>} : memref<16x128xf32, #tpu.memory_space<vmem>>, vector<16x128xf32>,
    } else {
    }
    return
  }
  func.func @transform_0(%arg0: i32, %arg1: i32) -> (i32, i32) {
    %c0_i32 = arith.constant 0 : i32
    return %arg0, %arg1 : i32, i32
  }
  func.func @transform_1(%arg0: i32, %arg1: i32) -> (i32, i32) {
    %c0_i32 = arith.constant 0 : i32
    %c0_i32_0 = arith.constant 0 : i32
    return %arg1, %c0_i32 : i32, i32
  }
  func.func @transform_2(%arg0: i32, %arg1: i32) -> (i32, i32) {
    %c0_i32 = arith.constant 0 : i32
    %c0_i32_0 = arith.constant 0 : i32
    %c0_i32_1 = arith.constant 0 : i32
    return %c0_i32, %c0_i32_0 : i32, i32
  }
  func.func @transform_3(%arg0: i32, %arg1: i32) -> (i32, i32) {
    %c0_i32 = arith.constant 0 : i32
    %c0_i32_0 = arith.constant 0 : i32
    %c0_i32_1 = arith.constant 0 : i32
    return %c0_i32, %c0_i32_0 : i32, i32
  }
  func.func @transform_4(%arg0: i32, %arg1: i32) -> (i32, i32) {
    %c0_i32 = arith.constant 0 : i32
    %c0_i32_0 = arith.constant 0 : i32
    %c0_i32_1 = arith.constant 0 : i32
    return %c0_i32, %c0_i32_0 : i32, i32
  }
  func.func @transform_5(%arg0: i32, %arg1: i32) -> (i32, i32) {
    %c0_i32 = arith.constant 0 : i32
    %c0_i32_0 = arith.constant 0 : i32
    %c0_i32_1 = arith.constant 0 : i32
    return %c0_i32, %c0_i32_0 : i32, i32
  }
  func.func @transform_6(%arg0: i32, %arg1: i32) -> (i32, i32) {
    %c0_i32 = arith.constant 0 : i32
    %c0_i32_0 = arith.constant 0 : i32
    return %arg0, %c0_i32 : i32, i32
  }
}

</mosaic_0001>

<bundles_post_ra>
// kernel: tpu_custom_call.1
= control target key start
LH: loop header
LB: loop body
LE: loop exit
PB: predicated region body
PF: predicated region fallthrough
CT: control target
= control target key end

     0   :  { %11 = vsyncpa [#allocation4], 0  ;;  %s712_s0 = inlined_call_operand.hbm [shape: bf16[16,128], index: 0, kind: input, shape index: {}]   ;;  %s713_s1 = inlined_call_operand.hbm [shape: bf16[128,128], index: 1, kind: input, shape index: {}]   ;;  %s714_s2 = inlined_call_operand.hbm [shape: bf16[128,128], index: 2, kind: input, shape index: {}]   ;;  %s715_s3 = inlined_call_operand.vmem [shape: f32[1,128], index: 3, kind: input, shape index: {}]   ;;  %s716_s4 = inlined_call_operand.hbm [shape: bf16[128,128], index: 4, kind: input, shape index: {}]   ;;  %s717_s5 = inlined_call_operand.vmem [shape: f32[1,128], index: 5, kind: input, shape index: {}]   ;;  %s718_s6 = inlined_call_operand.hbm [shape: f32[16,128], index: 6, kind: output, shape index: {}]  }
   0x1   :  { %12 = vsyncpa [#allocation7], 0 }
   0x2   :  { %13 = vsyncpa [#allocation10], 0 }
   0x3   :  { %14 = vsyncpa [#allocation5], 0  ;;  %s32_s23 = sshll.u32 %s713_s1, 4  ;;  %s647_s24 = smov [#allocation6]   ;;  %s33_s23 = int_to_ptr.hbm [resolvable:$true] %s32_s23 }
   0x4   :  { %s34_s25 = sshll.u32 %s647_s24, 4  ;;  %s19_s28 = sshll.u32 %s712_s0, 4  ;;  %s35_s25 = int_to_ptr.vmem [resolvable:$true] %s34_s25  ;;  %s20_s28 = int_to_ptr.hbm [resolvable:$true] %s19_s28 }
   0x5   :  { %s648_s29 = smov 64   ;;  %s649_s30 = smov 4  }
   0x6   :  { %40 = dma.hbm_to_vmem [thread:$0]  %s33_s23, 1024, %s35_s25, [#allocation7], %s648_s29, %s648_s29, %s649_s30  }
   0x7   :  { %s650_s7 = smov [#allocation3]   ;;  %s45_s11 = sshll.u32 %s714_s2, 4  ;;  %s46_s11 = int_to_ptr.hbm [resolvable:$true] %s45_s11 }
   0x8   :  { %s21_s8 = sshll.u32 %s650_s7, 4  ;;  %s60_s13 = sshll.u32 %s716_s4, 4  ;;  %s22_s8 = int_to_ptr.vmem [resolvable:$true] %s21_s8  ;;  %s61_s13 = int_to_ptr.hbm [resolvable:$true] %s60_s13 }
   0x9   :  { %27 = dma.hbm_to_vmem [thread:$0]  %s20_s28, 128, %s22_s8, [#allocation4], %s648_s29, %s648_s29, %s649_s30  }
   0xa   :  { %s651_s14 = smov [#allocation8]   ;;  %s652_s0 = smov [#allocation9]  }
   0xb   :  { %s47_s15 = sshll.u32 %s651_s14, 4  ;;  %s62_s16 = sshll.u32 %s652_s0, 4  ;;  %s48_s15 = int_to_ptr.vmem [resolvable:$true] %s47_s15  ;;  %s63_s16 = int_to_ptr.vmem [resolvable:$true] %s62_s16 }
   0xc   :  { %53 = dma.hbm_to_vmem [thread:$0]  %s46_s11, 1024, %s48_s15, [#allocation7], %s648_s29, %s648_s29, %s649_s30  }
   0xd   :  { %68 = dma.hbm_to_vmem [thread:$0]  %s61_s13, 1024, %s63_s16, [#allocation10], %s648_s29, %s648_s29, %s649_s30  }
   0xe   :  { %639 = dma.done.wait [#allocation4], 128  }
   0xf   :  { %640 = vsyncadd [#allocation4], 4294967168 }
  0x10   :  { %641 = dma.done.wait [#allocation7], 2048  }
  0x11   :  { %642 = vsyncadd [#allocation7], 4294965248 }
  0x12   :  { %643 = dma.done.wait [#allocation10], 1024  }
  0x13   :  { %644 = vsyncadd [#allocation10], 4294966272  ;;  %v491_v0 = vld [vmem:[#allocation6 + $0x38] sm:$0xff]  ;;  %v490_v1 = vld [vmem:[#allocation6 + $0x30] sm:$0xff]  ;;  %s653_s19 = smov [#allocation11]   ;;  %s654_s23 = smov 128  }
  0x14   :  { %167 = vmatpush.bf16.msra.mxu0 %v491_v0  ;;  %v499_v2 = vld [vmem:[#allocation8 + $0x38] sm:$0xff]  ;;  %v498_v3 = vld [vmem:[#allocation8 + $0x30] sm:$0xff]  ;;  %v489_v4 = vld [vmem:[#allocation6 + $0x28] sm:$0xff]  ;;  %s366_s20 = sshll.u32 %s653_s19, 4  ;;  %s655_s24 = smov 8   ;;  %s367_s20 = int_to_ptr.vmem [resolvable:$true] %s366_s20 }
  0x15   :  { %261 = vmatpush.bf16.msra.mxu1 %v499_v2  ;;  %v497_v5 = vld [vmem:[#allocation8 + $0x28] sm:$0xff]  ;;  %v488_v6 = vld [vmem:[#allocation6 + $0x20] sm:$0xff]  ;;  %v487_v8 = vld [vmem:[#allocation6 + $0x18] sm:$0xff] }
  0x16   :  { %v496_v7 = vld [vmem:[#allocation8 + $0x20] sm:$0xff]  ;;  %v495_v9 = vld [vmem:[#allocation8 + $0x18] sm:$0xff]  ;;  %v486_v10 = vld [vmem:[#allocation6 + $0x10] sm:$0xff] }
  0x17   :  { %v485_v11 = vld [vmem:[#allocation6 + $0x8] sm:$0xff]  ;;  %v484_v12 = vld [vmem:[#allocation6] sm:$0xff]  ;;  %v483_v13 = vld [vmem:[#allocation3] sm:$0xff] }
  0x18   :  { %168 = vmatpush.bf16.msra.mxu0 %v490_v1  ;;  %v494_v14 = vld [vmem:[#allocation8 + $0x10] sm:$0xff]  ;;  %v493_v15 = vld [vmem:[#allocation8 + $0x8] sm:$0xff]  ;;  %v492_v16 = vld [vmem:[#allocation8] sm:$0xff] }
  0x19   :  { %262 = vmatpush.bf16.msra.mxu1 %v498_v3  ;;  %v507_v17 = vld [vmem:[#allocation9 + $0x38] sm:$0xff]  ;;  %v506_v18 = vld [vmem:[#allocation9 + $0x30] sm:$0xff]  ;;  %v505_v19 = vld [vmem:[#allocation9 + $0x28] sm:$0xff] }
  0x1a   :  { %346 = vmatpush.bf16.msra.mxu2 %v507_v17  ;;  %v504_v20 = vld [vmem:[#allocation9 + $0x20] sm:$0xff]  ;;  %v503_v26 = vld [vmem:[#allocation9 + $0x18] sm:$0xff]  ;;  %v502_v27 = vld [vmem:[#allocation9 + $0x10] sm:$0xff] }
  0x1b   :  { %v501_v28 = vld [vmem:[#allocation9 + $0x8] sm:$0xff]  ;;  %v500_v29 = vld [vmem:[#allocation9] sm:$0xff]  ;;  %v517_v31 = vld [vmem:[%s715_s3] ss:$0 sm:$0xff]  ;;  %s368_s3 = sshll.u32 %s718_s6, 4  ;;  %s369_s3 = int_to_ptr.hbm [resolvable:$true] %s368_s3 }
  0x1c   :  { %169 = vmatpush.bf16.msra.mxu0 %v489_v4  ;;  %v518_v38 = vld [vmem:[%s717_s5] ss:$0 sm:$0xff] }
  0x1d   :  { %263 = vmatpush.bf16.msra.mxu1 %v497_v5 }
  0x1e   :  { %347 = vmatpush.bf16.msra.mxu2 %v506_v18 }
  0x20   :  { %170 = vmatpush.bf16.msra.mxu0 %v488_v6 }
  0x21   :  { %264 = vmatpush.bf16.msra.mxu1 %v496_v7 }
  0x22   :  { %348 = vmatpush.bf16.msra.mxu2 %v505_v19 }
  0x24   :  { %171 = vmatpush.bf16.msra.mxu0 %v487_v8 }
  0x25   :  { %265 = vmatpush.bf16.msra.mxu1 %v495_v9 }
  0x26   :  { %349 = vmatpush.bf16.msra.mxu2 %v504_v20 }
  0x28   :  { %172 = vmatpush.bf16.msra.mxu0 %v486_v10 }
  0x29   :  { %266 = vmatpush.bf16.msra.mxu1 %v494_v14 }
  0x2a   :  { %350 = vmatpush.bf16.msra.mxu2 %v503_v26 }
  0x2c   :  { %173 = vmatpush.bf16.msra.mxu0 %v485_v11 }
  0x2d   :  { %267 = vmatpush.bf16.msra.mxu1 %v493_v15 }
  0x2e   :  { %351 = vmatpush.bf16.msra.mxu2 %v502_v27 }
  0x30   :  { %174 = vmatpush.bf16.msra.mxu0 %v484_v12 }
  0x31   :  { %268 = vmatpush.bf16.msra.mxu1 %v492_v16 }
  0x32   :  { %352 = vmatpush.bf16.msra.mxu2 %v501_v28 }
  0x33   :  { %175 = vmatmul.bf16.vlgmr.msra.gmra.mxu0 %v483_v13 }
  0x36   :  { %353 = vmatpush.bf16.msra.mxu2 %v500_v29 }
  0xb0   :  { %v176_v21 = vpop.f32.mrf.mxu0 }
  0xb1   :  { %v190_v23 = vmul.f32 0.125, %v176_v21 }
  0xb8   :  { %v178_v22 = vpop.f32.mrf.mxu0 }
  0xb9   :  { %v191_v24 = vmul.f32 0.125, %v178_v22 }
  0xbb   :  { %v192_v25 = vpack.c.bf16 %v191_v24, %v190_v23 }
  0xbd   :  { %269 = vmatmul.bf16.vlgmr.msra.gmra.mxu1 %v192_v25 }
 0x13a   :  { %v270_v30 = vpop.f32.mrf.mxu1 }
 0x13b   :  { %v271_v32 = vadd.f32 %v517_v31, %v270_v30 }
 0x13d   :  { %v275_v35 = vmax.f32 %v271_v32, 0.0 }
 0x142   :  { %v272_v33 = vpop.f32.mrf.mxu1 }
 0x143   :  { %v273_v34 = vadd.f32 %v517_v31, %v272_v33 }
 0x145   :  { %v276_v36 = vmax.f32 %v273_v34, 0.0 }
 0x147   :  { %v277_v37 = vpack.c.bf16 %v276_v36, %v275_v35 }
 0x149   :  { %354 = vmatmul.bf16.vlgmr.msra.gmra.mxu2 %v277_v37 }
 0x1cc   :  { %v355_v39 = vpop.f32.mrf.mxu2 }
 0x1cd   :  { %v356_v40 = vadd.f32 %v518_v38, %v355_v39 }
 0x1cf   :  { %360 = vst [vmem:[#allocation11] sm:$0xff] %v356_v40 }
 0x1d4   :  { %v357_v41 = vpop.f32.mrf.mxu2 }
 0x1d5   :  { %v358_v42 = vadd.f32 %v518_v38, %v357_v41 }
 0x1d7   :  { %361 = vst [vmem:[#allocation11 + $0x8] sm:$0xff] %v358_v42 }
 0x1d8   :  { %374 = dma.vmem_to_hbm [thread:$0]  %s367_s20, 256, %s369_s3, [#allocation5], %s654_s23, %s654_s23, %s655_s24  }
 0x1d9   :  { %645 = dma.done.wait [#allocation5], 256  }
 0x1da   :  { %646 = vsyncadd [#allocation5], 4294967040 }
 0x1db   :  { %379 = vsyncpa [#allocation4], 1 }
 0x1dc   :  { %380 = vsyncpa [#allocation7], 1 }
 0x1dd   :  { %381 = vsyncpa [#allocation10], 1 }
 0x1de   :  { %382 = vsyncpa [#allocation5], 1 }

</bundles_post_ra>
